<compile_context>
chip_gen: v5e
topology: v5e:2x2
jax: 0.10.0
libtpu: 0.0.40
codegen_flags: <defaults>
</compile_context>

<pallas_src>
import functools
import math

import jax
import jax.numpy as jnp
from jax.experimental import pallas as pl
from jax.experimental.pallas import tpu as pltpu

_LANE = 128      # vreg lane width (last dim)
_SUBLANE = 8     # vreg sublane height (second-to-last dim)
_VMEM_LIMIT = 32 * 1024 * 1024   # safe on v5e/v6e/v7x (above scoped defaults, < physical)


def _round_up(n: int, m: int) -> int:
    return ((n + m - 1) // m) * m


def _latent_linear_kernel(x_ref, w_ref, b_ref, o_ref):
    # x_ref: (tb, K) streamed; w_ref: (K, N) VMEM-resident; b_ref: (1, N) f32 resident.
    acc = jnp.dot(x_ref[...], w_ref[...], preferred_element_type=jnp.float32)  # MXU, f32 acc
    o_ref[...] = (acc + b_ref[...]).astype(o_ref.dtype)


@functools.partial(jax.jit, static_argnames=("tile_b",))
def disentangled_ae_latent(x, w_t, b, *, tile_b: int = 32768):
    """z = x @ w_t + b, matching torch.nn.Linear(hidden_size, latent_size).

    x:   (batch, hidden)
    w_t: (hidden, latent)   -- transpose of PyTorch's (latent, hidden) weight
    b:   (latent,)
    tile_b: max original batch rows streamed per grid step (further capped by VMEM).
    """
    B, H = x.shape
    Hw, L = w_t.shape
    assert H == Hw and b.shape == (L,)
    out_dtype = x.dtype

    # ---- layout selection ----------------------------------------------------
    # If latent < 128 lanes, pack `pack` batch rows into one GEMM row so the
    # output is lane-dense with zero HBM padding/slicing.  Otherwise (or when the
    # batch doesn't pack cleanly) use the direct layout with full-extent L blocks.
    pack = 1
    if L % _LANE != 0:
        cand = _LANE // math.gcd(L, _LANE)          # smallest pack with pack*L % 128 == 0
        if (B % cand == 0 and B // cand >= _SUBLANE
                and cand * (H + L) * 4 <= 64 * 1024):
            pack = cand

    in_itemsize = jnp.dtype(x.dtype).itemsize
    out_itemsize = jnp.dtype(out_dtype).itemsize

    if pack > 1:
        rows, Kdim, Ndim = B // pack, pack * H, pack * L
        x_in = x.reshape(rows, Kdim)                               # contiguous: free reshape
        eye = jnp.eye(pack, dtype=w_t.dtype)
        w_in = jnp.einsum("ij,hl->ihjl", eye, w_t).reshape(Kdim, Ndim)  # tiny block-diag weight
        b_in = jnp.tile(b.astype(jnp.float32), pack).reshape(1, Ndim)
    else:
        rows, Kdim, Ndim = B, H, L
        x_in = x
        w_in = w_t
        b_in = b.astype(jnp.float32).reshape(1, L)

    # ---- tile the (packed) batch axis ----------------------------------------
    # Per grid step: double-buffered x tile + out tile, plus the f32 accumulator.
    per_row = 2 * (Kdim * in_itemsize + Ndim * out_itemsize) + Ndim * 4
    cap_rows = max(_SUBLANE, ((_VMEM_LIMIT // 2) // per_row) // _SUBLANE * _SUBLANE)
    cap_rows = min(cap_rows, max(_SUBLANE, tile_b // pack))

    nsteps = max(1, -(-rows // cap_rows))
    if rows > 2 * _SUBLANE:
        nsteps = max(nsteps, 2)          # >=2 grid steps so v7x megacore gets both TCs
    tb = _round_up(-(-rows // nsteps), _SUBLANE)
    # Partial last block: OOB reads are don't-care, OOB writes are masked, so no
    # wrapper-side batch pad and no output slice (no extra HBM passes).
    grid = (pl.cdiv(rows, tb),)

    cost = pl.CostEstimate(
        flops=2 * B * H * L,
        transcendentals=0,
        bytes_accessed=(rows * Kdim * in_itemsize                       # x (read once)
                        + Kdim * Ndim * jnp.dtype(w_in.dtype).itemsize  # weight (resident)
                        + Ndim * 4                                      # bias
                        + rows * Ndim * out_itemsize),                  # z (written once)
    )

    out = pl.pallas_call(
        _latent_linear_kernel,
        out_shape=jax.ShapeDtypeStruct((rows, Ndim), out_dtype),
        grid=grid,
        in_specs=[
            pl.BlockSpec((tb, Kdim), lambda i: (i, 0)),    # x: streams over batch tiles
            pl.BlockSpec((Kdim, Ndim), lambda i: (0, 0)),  # weight: VMEM-resident
            pl.BlockSpec((1, Ndim), lambda i: (0, 0)),     # bias:   VMEM-resident
        ],
        out_specs=pl.BlockSpec((tb, Ndim), lambda i: (i, 0)),
        compiler_params=pltpu.CompilerParams(
            dimension_semantics=("parallel",),             # megacore-shardable batch axis
            vmem_limit_bytes=_VMEM_LIMIT,
        ),
        cost_estimate=cost,
    )(x_in, w_in, b_in)

    # Packed output is bit-identical in memory to z (B, L): reshape is free.
    return out.reshape(B, L) if pack > 1 else out


if __name__ == "__main__":
    # Module hyperparameters (dropout is unused in forward, kept for parity).
    hidden_size = 32
    latent_size = 16
    dropout = 0.1  # noqa: F841  (stored but never applied, matching the PyTorch module)

    key = jax.random.PRNGKey(0)
    kx, kw, kb, kx2, kx3 = jax.random.split(key, 5)

    # Deterministic synthetic parameters (PyTorch shapes: W (latent, hidden), b (latent,))
    W = jax.random.normal(kw, (latent_size, hidden_size), dtype=jnp.float32) * 0.1
    b = jax.random.normal(kb, (latent_size,), dtype=jnp.float32) * 0.1
    W_t = W.T  # (hidden, latent) kernel layout

    # --- check 1: the module's natural tiny shape (direct path, exact block) --
    x = jax.random.normal(kx, (8, hidden_size), dtype=jnp.float32)
    z = jax.block_until_ready(disentangled_ae_latent(x, W_t, b))
    z_ref = x @ W_t + b
    assert z.shape == (8, latent_size)
    assert jnp.allclose(z, z_ref, atol=1e-5, rtol=1e-5)

    # --- check 2: batch-lane-packed path (B % 8 == 0, lane-dense 128 output) --
    x2 = jax.random.normal(kx2, (128, hidden_size), dtype=jnp.float32)
    z2 = jax.block_until_ready(disentangled_ae_latent(x2, W_t, b))
    z2_ref = x2 @ W_t + b
    assert z2.shape == (128, latent_size)
    assert jnp.allclose(z2, z2_ref, atol=1e-5, rtol=1e-5)

    # --- check 3: direct path with multi-step grid + masked partial last block
    x3 = jax.random.normal(kx3, (300, hidden_size), dtype=jnp.float32)
    z3 = jax.block_until_ready(disentangled_ae_latent(x3, W_t, b))
    z3_ref = x3 @ W_t + b
    assert z3.shape == (300, latent_size)
    assert jnp.allclose(z3, z3_ref, atol=1e-5, rtol=1e-5)

    print("KERNEL_OK")
</pallas_src>

<mosaic_0001>
module attributes {stable_mosaic.version = 11 : i64} {
  func.func @_latent_linear_kernel(%arg0: i32, %arg1: memref<8x32xf32, #tpu.memory_space<vmem>>, %arg2: memref<32x16xf32, #tpu.memory_space<vmem>>, %arg3: memref<1x16xf32, #tpu.memory_space<vmem>>, %arg4: memref<8x16xf32, #tpu.memory_space<vmem>>) attributes {dimension_semantics = [#tpu.dimension_semantics<parallel>], iteration_bounds = array<i64: 1>, scalar_prefetch = 0 : i64, scratch_operands = 0 : i64, tpu.core_type = #tpu.core_type<tc>, window_params = [{transform_indices = @transform_0, window_bounds = array<i64: 8, 32>}, {pipeline_mode = #tpu.pipeline_mode<synchronous>, transform_indices = @transform_1, window_bounds = array<i64: 32, 16>}, {pipeline_mode = #tpu.pipeline_mode<synchronous>, transform_indices = @transform_2, window_bounds = array<i64: 1, 16>}, {transform_indices = @transform_3, window_bounds = array<i64: 8, 16>}]} {
    %c0 = arith.constant 0 : index
    %c0_0 = arith.constant 0 : index
    %0 = vector.load %arg1[%c0, %c0_0] : memref<8x32xf32, #tpu.memory_space<vmem>>, vector<8x32xf32>
    %c0_1 = arith.constant 0 : index
    %c0_2 = arith.constant 0 : index
    %1 = vector.load %arg2[%c0_1, %c0_2] : memref<32x16xf32, #tpu.memory_space<vmem>>, vector<32x16xf32>
    %cst = arith.constant dense<0.000000e+00> : vector<8x16xf32>
    %2 = tpu.matmul %0, %1, %cst {dimension_numbers = #tpu.dot_dimension_numbers<[1], [0], [0], [1], [0, 0, 1, 1], [], []>} : vector<8x32xf32>, vector<32x16xf32>, vector<8x16xf32> -> vector<8x16xf32>
    %c0_3 = arith.constant 0 : index
    %c0_4 = arith.constant 0 : index
    %3 = vector.load %arg3[%c0_3, %c0_4] : memref<1x16xf32, #tpu.memory_space<vmem>>, vector<1x16xf32>
    %4 = vector.broadcast %3 : vector<1x16xf32> to vector<8x16xf32>
    %5 = arith.addf %2, %4 : vector<8x16xf32>
    %c0_5 = arith.constant 0 : index
    %c0_6 = arith.constant 0 : index
    %6 = vector.load %arg4[%c0_5, %c0_6] : memref<8x16xf32, #tpu.memory_space<vmem>>, vector<8x16xf32>
    tpu.vector_store %arg4[%c0_5, %c0_6], %5 {strides = array<i32>} : memref<8x16xf32, #tpu.memory_space<vmem>>, vector<8x16xf32>,
    return
  }
  func.func @transform_0(%arg0: i32) -> (i32, i32) {
    %c0_i32 = arith.constant 0 : i32
    %c0_i32_0 = arith.constant 0 : i32
    return %arg0, %c0_i32 : i32, i32
  }
  func.func @transform_1(%arg0: i32) -> (i32, i32) {
    %c0_i32 = arith.constant 0 : i32
    %c0_i32_0 = arith.constant 0 : i32
    %c0_i32_1 = arith.constant 0 : i32
    return %c0_i32, %c0_i32_0 : i32, i32
  }
  func.func @transform_2(%arg0: i32) -> (i32, i32) {
    %c0_i32 = arith.constant 0 : i32
    %c0_i32_0 = arith.constant 0 : i32
    %c0_i32_1 = arith.constant 0 : i32
    return %c0_i32, %c0_i32_0 : i32, i32
  }
  func.func @transform_3(%arg0: i32) -> (i32, i32) {
    %c0_i32 = arith.constant 0 : i32
    %c0_i32_0 = arith.constant 0 : i32
    return %arg0, %c0_i32 : i32, i32
  }
}

</mosaic_0001>

<bundles_post_ra>
// kernel: disentangled_ae_latent.1
= control target key start
LH: loop header
LB: loop body
LE: loop exit
PB: predicated region body
PF: predicated region fallthrough
CT: control target
= control target key end

     0   :  { %s137_s0 = inlined_call_operand.vmem [shape: f32[8,32], index: 0, kind: input, shape index: {}]   ;;  %s138_s1 = inlined_call_operand.vmem [shape: f32[32,16], index: 1, kind: input, shape index: {}]   ;;  %s139_s2 = inlined_call_operand.vmem [shape: f32[1,16], index: 2, kind: input, shape index: {}]   ;;  %s140_s3 = inlined_call_operand.hbm [shape: f32[8,16], index: 3, kind: output, shape index: {}]  }
   0x1   :  { %v19_v0 = vld [vmem:[%s138_s1 + $0x18] sm:$0xff]  ;;  %v18_v1 = vld [vmem:[%s138_s1 + $0x10] sm:$0xff]  ;;  %v17_v2 = vld [vmem:[%s138_s1 + $0x8] sm:$0xff] }
   0x2   :  { %40 = vmatpush.msra.mxu0 %v19_v0 }
   0x3   :  { %8 = vsyncpa [#allocation3], 0  ;;  %v16_v3 = vld [vmem:[%s138_s1] sm:$0xff]  ;;  %vm24_vm0 = vcmask 261120   ;;  %s95_s24 = smov [#allocation2]   ;;  %s57_s28 = sshll.u32 %s140_s3, 4  ;;  %s58_s28 = int_to_ptr.hbm [resolvable:$true] %s57_s28 }
   0x4   :  { %41 = vmatpush.msra.mxu0 %v18_v1  ;;  %v15_v4 = vld [vmem:[%s137_s0] sm:$0xff]  ;;  %s55_s25 = sshll.u32 %s95_s24, 4  ;;  %vm48_vm1 = vcmask 130048   ;;  %s56_s25 = int_to_ptr.vmem [resolvable:$true] %s55_s25 }
   0x5   :  { %v68_v5 = vld [vmem:[%s139_s2] ss:$0 sm:$0xff] }
   0x6   :  { %42 = vmatpush.msra.mxu0 %v17_v2 }
   0x8   :  { %43 = vmatpush.msra.mxu0 %v16_v3 }
   0x9   :  { %66 = vmatmul.msk.f32.vlgmr.msra.gmra.mxu0 %vm24_vm0, %v15_v4 }
  0x86   :  { %v45_v6 = vpop.f32.mrf.mxu0 }
  0x87   :  { %v46_v7 = vadd.f32 %v68_v5, %v45_v6 }
  0x89   :  { %49 = vst.msk [vmem:[#allocation2] sm:$0xff] %vm48_vm1, %v46_v7 }
  0x8a   :  { %60 = dma.vmem_to_hbm [thread:$0]  %s56_s25, 128, %s58_s28, [#allocation3]  }
  0x8b   :  { %93 = dma.done.wait [#allocation3], 128  }
  0x8c   :  { %94 = vsyncadd [#allocation3], 4294967168 }
  0x8d   :  { %65 = vsyncpa [#allocation3], 1 }

</bundles_post_ra>
